<compile_context>
chip_gen: v6e
topology: v6e:2x2x1
jax: 0.10.0
libtpu: 0.0.40
codegen_flags: <defaults>
</compile_context>

<pallas_src>
import math
from functools import partial

import jax
import jax.numpy as jnp
from jax import lax
from jax.experimental import pallas as pl
from jax.experimental.pallas import tpu as pltpu

_NEG_INF = -1e30            # finite "minus infinity" for the causal mask (avoids inf-inf NaNs)
_LN_EPS = 1e-12             # matches nn.LayerNorm(eps=1e-12)
_VMEM_LIMIT = 48 * 1024 * 1024   # safe on v5e/v6e (128 MiB phys) and v7x (64 MiB phys)

# TODO(synk): all nn.Dropout layers are identity in eval mode; training-mode dropout is not
# implemented.


def _cparams(*semantics):
    return pltpu.CompilerParams(dimension_semantics=semantics,
                                vmem_limit_bytes=_VMEM_LIMIT)


# ----------------------------------------------------------------------------
# Single-buffered weight BlockSpecs (constant index across the grid).
# Probed at runtime so the script still runs if pl.Buffered(1) is unsupported.
# ----------------------------------------------------------------------------
_BUFFERED_OK = None


def _buffered_ok():
    global _BUFFERED_OK
    if _BUFFERED_OK is None:
        try:
            def _probe(x_ref, o_ref):
                o_ref[...] = x_ref[...] + 1.0

            spec = pl.BlockSpec((8, 128), lambda i: (0, 0), pipeline_mode=pl.Buffered(1))
            fn = pl.pallas_call(
                _probe,
                out_shape=jax.ShapeDtypeStruct((8, 128), jnp.float32),
                grid=(1,),
                in_specs=[spec],
                out_specs=pl.BlockSpec((8, 128), lambda i: (0, 0)),
            )
            y = jax.block_until_ready(fn(jnp.ones((8, 128), jnp.float32)))
            _BUFFERED_OK = bool(jnp.all(y == 2.0))
        except Exception:
            _BUFFERED_OK = False
    return _BUFFERED_OK


def _weight_spec(shape):
    nd = len(shape)
    zero_map = lambda *_: (0,) * nd
    if _buffered_ok():
        return pl.BlockSpec(tuple(shape), zero_map, pipeline_mode=pl.Buffered(1))
    return pl.BlockSpec(tuple(shape), zero_map)


def _batch_spec(shape):
    nd = len(shape)
    return pl.BlockSpec((1,) + tuple(shape[1:]), lambda b, *_: (b,) + (0,) * (nd - 1))


def _choose_tile(n, target, granule=128):
    """Largest granule-multiple divisor of n that is <= target (n itself if small/ragged)."""
    if n <= target or n % granule != 0:
        return n
    t = (target // granule) * granule
    while t > granule and n % t != 0:
        t -= granule
    return t if n % t == 0 else n


# ----------------------------------------------------------------------------
# Kernel-side helpers
# ----------------------------------------------------------------------------
def _layernorm(x, gamma, beta):
    x = x.astype(jnp.float32)
    mu = jnp.mean(x, axis=-1, keepdims=True)
    var = jnp.mean(jnp.square(x - mu), axis=-1, keepdims=True)
    return (x - mu) * lax.rsqrt(var + _LN_EPS) * gamma + beta


# ----------------------------------------------------------------------------
# Pallas kernels
# ----------------------------------------------------------------------------
def _embed_ln_kernel(x_ref, pos_ref, g_ref, b_ref, o_ref):
    # (already gathered) token embeddings + positional encoding, then LayerNorm.
    x = x_ref[0].astype(jnp.float32) + pos_ref[...]
    o_ref[0] = _layernorm(x, g_ref[...], b_ref[...]).astype(o_ref.dtype)


def _ln_qkv_kernel(x_ref, g_ref, b_ref, w_ref, b3_ref, q_ref, k_ref, v_ref):
    """LayerNorm + fused Q/K/V projection (self-attention: q = k = v source).

    w_ref: pre-transposed block-diagonal [wQ|wK|wV], shape (H, 3H), 1/sqrt(dph) folded into
    the Q columns.  b3_ref: (1, 3H) f32 bias.
    """
    h = x_ref.shape[-1]
    xn = _layernorm(x_ref[0], g_ref[...], b_ref[...]).astype(w_ref.dtype)
    qkv = jnp.dot(xn, w_ref[...], preferred_element_type=jnp.float32) + b3_ref[...]
    q_ref[0] = qkv[:, :h].astype(q_ref.dtype)
    k_ref[0] = qkv[:, h:2 * h].astype(k_ref.dtype)
    v_ref[0] = qkv[:, 2 * h:].astype(v_ref.dtype)


def _ln_q_kernel(x_ref, g_ref, b_ref, w_ref, bq_ref, q_ref):
    # Cross-attention query path: LayerNorm + Q-only projection (K/V are hoisted).
    xn = _layernorm(x_ref[0], g_ref[...], b_ref[...]).astype(w_ref.dtype)
    q = jnp.dot(xn, w_ref[...], preferred_element_type=jnp.float32) + bq_ref[...]
    q_ref[0] = q.astype(q_ref.dtype)


def _kv_proj_kernel(x_ref, w_ref, b_ref, k_ref, v_ref):
    # Hoisted cross-attention K/V projection of enc_out (no LayerNorm in the reference).
    h = x_ref.shape[-1]
    x = x_ref[0].astype(w_ref.dtype)
    kv = jnp.dot(x, w_ref[...], preferred_element_type=jnp.float32) + b_ref[...]
    k_ref[0] = kv[:, :h].astype(k_ref.dtype)
    v_ref[0] = kv[:, h:].astype(v_ref.dtype)


def _flash_attn_kernel(q_ref, k_ref, v_ref, o_ref, m_sc, l_sc, acc_sc, *,
                       masked, tk, mm_dtype, approx_recip):
    """Online-softmax attention for ALL heads of one batch element; Sk tiled on the grid."""
    kidx = pl.program_id(1)

    @pl.when(kidx == 0)
    def _():
        m_sc[...] = jnp.full(m_sc.shape, _NEG_INF, m_sc.dtype)
        l_sc[...] = jnp.zeros(l_sc.shape, l_sc.dtype)
        acc_sc[...] = jnp.zeros(acc_sc.shape, acc_sc.dtype)

    q = q_ref[0].astype(mm_dtype)            # (h, Sq, dph)  scale already folded into Q
    k = k_ref[0].astype(mm_dtype)            # (h, tk, dph)
    v = v_ref[0].astype(mm_dtype)            # (h, tk, dph)

    s = jnp.einsum("hqd,hkd->hqk", q, k, preferred_element_type=jnp.float32)
    if masked:
        sq = q.shape[1]
        rows = lax.broadcasted_iota(jnp.int32, (sq, tk), 0)
        cols = lax.broadcasted_iota(jnp.int32, (sq, tk), 1) + kidx * tk
        s = jnp.where((rows >= cols)[None], s, _NEG_INF)

    m_prev = m_sc[...]
    m_new = jnp.maximum(m_prev, jnp.max(s, axis=-1, keepdims=True))
    alpha = jnp.exp(m_prev - m_new)
    p = jnp.exp(s - m_new)
    l_sc[...] = alpha * l_sc[...] + jnp.sum(p, axis=-1, keepdims=True)
    acc_sc[...] = alpha * acc_sc[...] + jnp.einsum(
        "hqk,hkd->hqd", p.astype(mm_dtype), v, preferred_element_type=jnp.float32)
    m_sc[...] = m_new

    @pl.when(kidx == pl.num_programs(1) - 1)
    def _():
        denom = l_sc[...]
        if approx_recip:
            out = acc_sc[...] * pl.reciprocal(denom, approx=True)   # EUP slot
        else:
            out = acc_sc[...] / denom
        o_ref[0] = out.astype(o_ref.dtype)


def _proj_res_kernel(ctx_ref, res_ref, wo_ref, bo_ref, o_ref):
    # attention output projection (pre-transposed weight) fused with the residual add.
    out = jnp.dot(ctx_ref[0].astype(wo_ref.dtype), wo_ref[...],
                  preferred_element_type=jnp.float32) + bo_ref[...]
    o_ref[0] = (res_ref[0].astype(jnp.float32) + out).astype(o_ref.dtype)


def _proj_res_ffn_kernel(ctx_ref, res_ref, wo_ref, bo_ref, g_ref, b_ref,
                         w1_ref, b1_ref, w2_ref, b2_ref, o_ref,
                         x1_sc, xn_sc, acc_sc):
    """x1 = res + ctx @ wo + bo ; out = x1 + Lin2(GELU(Lin1(LN(x1)))), F tiled on the grid."""
    f = pl.program_id(1)

    @pl.when(f == 0)
    def _():
        attn_out = jnp.dot(ctx_ref[0].astype(wo_ref.dtype), wo_ref[...],
                           preferred_element_type=jnp.float32) + bo_ref[...]
        x1 = res_ref[0].astype(jnp.float32) + attn_out
        x1_sc[...] = x1
        xn_sc[...] = _layernorm(x1, g_ref[...], b_ref[...]).astype(xn_sc.dtype)
        acc_sc[...] = jnp.zeros(acc_sc.shape, acc_sc.dtype)

    hid = jnp.dot(xn_sc[...], w1_ref[...], preferred_element_type=jnp.float32) + b1_ref[...]
    # TODO(synk): nn.GELU defaults to the exact erf form; the tanh approximation is used here.
    hid = jax.nn.gelu(hid, approximate=True).astype(w2_ref.dtype)
    acc_sc[...] += jnp.dot(hid, w2_ref[...], preferred_element_type=jnp.float32)

    @pl.when(f == pl.num_programs(1) - 1)
    def _():
        o_ref[0] = (x1_sc[...] + acc_sc[...] + b2_ref[...]).astype(o_ref.dtype)


def _generator_kernel(x_ref, w_ref, b_ref, o_ref):
    y = jnp.dot(x_ref[0].astype(w_ref.dtype), w_ref[...],
                preferred_element_type=jnp.float32) + b_ref[...]
    o_ref[0] = jnp.tanh(y).astype(o_ref.dtype)


# ----------------------------------------------------------------------------
# pallas_call wrappers
# ----------------------------------------------------------------------------
def _embed_pallas(tokens, emb, *, act_dtype):
    # TODO(synk): the nn.Embedding token gather is data-dependent indexing; it is left to XLA
    # here (at scale it would become a scalar-prefetch / DMA gather inside the kernel).
    B, S = tokens.shape
    table = emb["table"]
    H = table.shape[1]
    gathered = table[tokens]                    # (B, S, H) f32
    pos = emb["pos"][:S]                        # (S, H)
    return pl.pallas_call(
        _embed_ln_kernel,
        out_shape=jax.ShapeDtypeStruct((B, S, H), act_dtype),
        grid=(B,),
        in_specs=[_batch_spec((B, S, H)), _weight_spec((S, H)),
                  _weight_spec((1, H)), _weight_spec((1, H))],
        out_specs=_batch_spec((B, S, H)),
        compiler_params=_cparams("parallel"),
    )(gathered, pos, emb["gamma"], emb["beta"])


def _ln_qkv_pallas(x, p, *, mm_dtype, act_dtype):
    del mm_dtype  # weights already carry the matmul dtype
    B, S, H = x.shape
    return pl.pallas_call(
        _ln_qkv_kernel,
        out_shape=(jax.ShapeDtypeStruct((B, S, H), act_dtype),) * 3,
        grid=(B,),
        in_specs=[_batch_spec((B, S, H)),
                  _weight_spec((1, H)), _weight_spec((1, H)),
                  _weight_spec((H, 3 * H)), _weight_spec((1, 3 * H))],
        out_specs=(_batch_spec((B, S, H)),) * 3,
        compiler_params=_cparams("parallel"),
    )(x, p["ln_g"], p["ln_b"], p["wqkv"], p["bqkv"])


def _ln_q_pallas(x, p, *, mm_dtype, act_dtype):
    del mm_dtype
    B, S, H = x.shape
    return pl.pallas_call(
        _ln_q_kernel,
        out_shape=jax.ShapeDtypeStruct((B, S, H), act_dtype),
        grid=(B,),
        in_specs=[_batch_spec((B, S, H)),
                  _weight_spec((1, H)), _weight_spec((1, H)),
                  _weight_spec((H, H)), _weight_spec((1, H))],
        out_specs=_batch_spec((B, S, H)),
        compiler_params=_cparams("parallel"),
    )(x, p["ln_g"], p["ln_b"], p["wq"], p["bq"])


def _kv_proj_pallas(x, p, *, mm_dtype, act_dtype):
    del mm_dtype
    B, S, H = x.shape
    return pl.pallas_call(
        _kv_proj_kernel,
        out_shape=(jax.ShapeDtypeStruct((B, S, H), act_dtype),) * 2,
        grid=(B,),
        in_specs=[_batch_spec((B, S, H)),
                  _weight_spec((H, 2 * H)), _weight_spec((1, 2 * H))],
        out_specs=(_batch_spec((B, S, H)),) * 2,
        compiler_params=_cparams("parallel"),
    )(x, p["wkv"], p["bkv"])


def _flash_attn_pallas(qh, kh, vh, *, masked, mm_dtype, act_dtype, approx_recip):
    B, n_heads, Sq, dph = qh.shape
    Sk = kh.shape[2]
    tk = _choose_tile(Sk, 512)
    nk = Sk // tk
    kernel = partial(_flash_attn_kernel, masked=masked, tk=tk,
                     mm_dtype=mm_dtype, approx_recip=approx_recip)
    return pl.pallas_call(
        kernel,
        out_shape=jax.ShapeDtypeStruct((B, n_heads, Sq, dph), act_dtype),
        grid=(B, nk),
        in_specs=[
            pl.BlockSpec((1, n_heads, Sq, dph), lambda b, k: (b, 0, 0, 0)),
            pl.BlockSpec((1, n_heads, tk, dph), lambda b, k: (b, 0, k, 0)),
            pl.BlockSpec((1, n_heads, tk, dph), lambda b, k: (b, 0, k, 0)),
        ],
        out_specs=pl.BlockSpec((1, n_heads, Sq, dph), lambda b, k: (b, 0, 0, 0)),
        scratch_shapes=[
            pltpu.VMEM((n_heads, Sq, 1), jnp.float32),     # running max
            pltpu.VMEM((n_heads, Sq, 1), jnp.float32),     # running denom
            pltpu.VMEM((n_heads, Sq, dph), jnp.float32),   # PV accumulator
        ],
        compiler_params=_cparams("parallel", "arbitrary"),
    )(qh, kh, vh)


def _proj_res_pallas(ctx, res, p, *, mm_dtype, act_dtype):
    del mm_dtype
    B, S, H = res.shape
    return pl.pallas_call(
        _proj_res_kernel,
        out_shape=jax.ShapeDtypeStruct((B, S, H), act_dtype),
        grid=(B,),
        in_specs=[_batch_spec((B, S, H)), _batch_spec((B, S, H)),
                  _weight_spec((H, H)), _weight_spec((1, H))],
        out_specs=_batch_spec((B, S, H)),
        compiler_params=_cparams("parallel"),
    )(ctx, res, p["wo"], p["bo"])


def _proj_res_ffn_pallas(ctx, res, pa, pf, *, mm_dtype, act_dtype):
    B, S, H = res.shape
    F = pf["w1"].shape[1]
    tf = _choose_tile(F, 2048)
    nf = F // tf
    return pl.pallas_call(
        _proj_res_ffn_kernel,
        out_shape=jax.ShapeDtypeStruct((B, S, H), act_dtype),
        grid=(B, nf),
        in_specs=[
            _batch_spec((B, S, H)),                       # ctx (merged heads)
            _batch_spec((B, S, H)),                       # residual
            _weight_spec((H, H)), _weight_spec((1, H)),   # wo, bo
            _weight_spec((1, H)), _weight_spec((1, H)),   # ln gamma, beta
            pl.BlockSpec((H, tf), lambda b, f: (0, f)),   # w1 tile
            pl.BlockSpec((1, tf), lambda b, f: (0, f)),   # b1 tile
            pl.BlockSpec((tf, H), lambda b, f: (f, 0)),   # w2 tile
            _weight_spec((1, H)),                         # b2
        ],
        out_specs=_batch_spec((B, S, H)),
        scratch_shapes=[
            pltpu.VMEM((S, H), jnp.float32),   # x1 (post-attention residual stream)
            pltpu.VMEM((S, H), mm_dtype),      # LN(x1) in matmul dtype
            pltpu.VMEM((S, H), jnp.float32),   # FFN output accumulator
        ],
        compiler_params=_cparams("parallel", "arbitrary"),
    )(ctx, res, pa["wo"], pa["bo"], pf["ln_g"], pf["ln_b"],
      pf["w1"], pf["b1"], pf["w2"], pf["b2"])


def _generator_pallas(x, p, *, mm_dtype):
    del mm_dtype
    B, S, H = x.shape
    V = p["w"].shape[1]
    tv = _choose_tile(V, 2048)
    nv = V // tv
    return pl.pallas_call(
        _generator_kernel,
        out_shape=jax.ShapeDtypeStruct((B, S, V), jnp.float32),
        grid=(B, nv),
        in_specs=[
            _batch_spec((B, S, H)),
            pl.BlockSpec((H, tv), lambda b, v: (0, v)),
            pl.BlockSpec((1, tv), lambda b, v: (0, v)),
        ],
        out_specs=pl.BlockSpec((1, S, tv), lambda b, v: (b, 0, v)),
        compiler_params=_cparams("parallel", "parallel"),
    )(x, p["w"], p["b"])


# ----------------------------------------------------------------------------
# Full forward pass
# ----------------------------------------------------------------------------
def transformer_forward(src_tok, tgt_tok, fp, *, n_heads, num_layers,
                        mm_dtype=jnp.float32, act_dtype=jnp.float32, approx_recip=True):
    """Full Transformer.forward(src_token, tgt_token) built from Pallas kernels."""
    kw = dict(mm_dtype=mm_dtype, act_dtype=act_dtype)
    akw = dict(mm_dtype=mm_dtype, act_dtype=act_dtype, approx_recip=approx_recip)

    def heads(t):                               # flat head split (matches torch .reshape)
        B, S, H = t.shape
        return t.reshape(B, n_heads, S, H // n_heads)

    def merge(t):                               # flat head merge (matches torch .reshape)
        B, h, S, d = t.shape
        return t.reshape(B, S, h * d)

    # ---- encode ----   (the PyTorch module reuses the SAME sub-modules every layer)
    x = _embed_pallas(src_tok, fp["embed"], act_dtype=act_dtype)
    for _ in range(num_layers):
        qp, kp, vp = _ln_qkv_pallas(x, fp["enc_attn"], **kw)
        ctx = _flash_attn_pallas(heads(qp), heads(kp), heads(vp), masked=False, **akw)
        x = _proj_res_ffn_pallas(merge(ctx), x, fp["enc_attn"], fp["enc_ffn"], **kw)
    enc_out = x

    # ---- decode ----
    q = _embed_pallas(tgt_tok, fp["embed"], act_dtype=act_dtype)
    # hoisted: cross-attention K/V of enc_out is identical in every decoder layer
    kc, vc = _kv_proj_pallas(enc_out, fp["dec_cross"], **kw)
    kc, vc = heads(kc), heads(vc)
    for _ in range(num_layers):
        # masked self-attention
        qp, kp, vp = _ln_qkv_pallas(q, fp["dec_self"], **kw)
        ctx = _flash_attn_pallas(heads(qp), heads(kp), heads(vp), masked=True, **akw)
        q = _proj_res_pallas(merge(ctx), q, fp["dec_self"], **kw)
        # cross-attention (hoisted K/V) fused with the feed-forward epilogue
        qc = _ln_q_pallas(q, fp["dec_cross"], **kw)
        ctx = _flash_attn_pallas(heads(qc), kc, vc, masked=False, **akw)
        q = _proj_res_ffn_pallas(merge(ctx), q, fp["dec_cross"], fp["dec_ffn"], **kw)

    return _generator_pallas(q, fp["generator"], mm_dtype=mm_dtype)


# ----------------------------------------------------------------------------
# Wrapper-side parameter fusion (pre-transpose, block-diag fuse, fold 1/sqrt(dph))
# ----------------------------------------------------------------------------
def _fuse_mha(ln, p, n_heads, mm_dtype):
    ln_g, ln_b = ln
    wq, bq = p["wQ"]
    wk, bk = p["wK"]
    wv, bv = p["wV"]
    wf, bf = p["ffn"]
    dph = wq.shape[0]
    H = dph * n_heads
    scale = 1.0 / math.sqrt(dph)                # ScaledDotProductAttention scale (h_dim = dph)
    eye = jnp.eye(n_heads, dtype=jnp.float32)
    wq_bd = jnp.kron(eye, wq.T) * scale
    wk_bd = jnp.kron(eye, wk.T)
    wv_bd = jnp.kron(eye, wv.T)
    bq_f = jnp.tile(bq, n_heads) * scale
    bk_f = jnp.tile(bk, n_heads)
    bv_f = jnp.tile(bv, n_heads)
    return dict(
        ln_g=ln_g.reshape(1, H), ln_b=ln_b.reshape(1, H),
        wqkv=jnp.concatenate([wq_bd, wk_bd, wv_bd], axis=1).astype(mm_dtype),
        bqkv=jnp.concatenate([bq_f, bk_f, bv_f]).reshape(1, 3 * H),
        wq=wq_bd.astype(mm_dtype), bq=bq_f.reshape(1, H),
        wkv=jnp.concatenate([wk_bd, wv_bd], axis=1).astype(mm_dtype),
        bkv=jnp.concatenate([bk_f, bv_f]).reshape(1, 2 * H),
        wo=wf.T.astype(mm_dtype), bo=bf.reshape(1, H),
    )


def _fuse_ffn(ln, p, mm_dtype):
    ln_g, ln_b = ln
    w1, b1 = p["lin1"]
    w2, b2 = p["lin2"]
    H = w1.shape[1]
    F = w1.shape[0]
    return dict(ln_g=ln_g.reshape(1, H), ln_b=ln_b.reshape(1, H),
                w1=w1.T.astype(mm_dtype), b1=b1.reshape(1, F),
                w2=w2.T.astype(mm_dtype), b2=b2.reshape(1, H))


def _fuse_embed(table, pos, ln):
    g, b = ln
    H = table.shape[1]
    return dict(table=table, pos=pos, gamma=g.reshape(1, H), beta=b.reshape(1, H))


def _fuse_generator(gen, mm_dtype):
    w, b = gen
    # TODO(synk): on v7x the generator / FFN weights could additionally be cast to fp8.
    return dict(w=w.T.astype(mm_dtype), b=b.reshape(1, -1))


def build_fused_params(params, *, n_heads, mm_dtype):
    return dict(
        embed=_fuse_embed(params["emb_table"], params["pos_enc"], params["emb_ln"]),
        enc_attn=_fuse_mha(params["enc_norm1"], params["enc_attn"], n_heads, mm_dtype),
        enc_ffn=_fuse_ffn(params["enc_norm2"], params["enc_ffn"], mm_dtype),
        dec_self=_fuse_mha(params["dec_norm1"], params["dec_self"], n_heads, mm_dtype),
        dec_cross=_fuse_mha(params["dec_norm2"], params["dec_cross"], n_heads, mm_dtype),
        dec_ffn=_fuse_ffn(params["dec_norm3"], params["dec_ffn"], mm_dtype),
        generator=_fuse_generator(params["gen"], mm_dtype),
    )


# ----------------------------------------------------------------------------
# Positional encoding (faithful to the PyTorch buffer, including its row-indexed freq)
# ----------------------------------------------------------------------------
def positional_encoding(seq_len, h_dim):
    assert seq_len % 2 == 0
    pos = jnp.broadcast_to(jnp.arange(seq_len, dtype=jnp.float32)[:, None], (seq_len, h_dim))
    freq = jnp.power(10000.0,
                     2.0 * jnp.floor(jnp.arange(seq_len, dtype=jnp.float32) * 0.5) / h_dim)
    freq = jnp.broadcast_to(freq[:, None], (seq_len, h_dim))
    pe = pos / freq
    pe = pe.at[:, 0::2].set(jnp.sin(pe[:, 0::2]))
    pe = pe.at[:, 1::2].set(jnp.cos(pe[:, 1::2]))
    return pe


# ----------------------------------------------------------------------------
# Pure-JAX reference (mirrors the PyTorch forward in eval mode)
# ----------------------------------------------------------------------------
def transformer_ref(src_tok, tgt_tok, params, *, n_heads, num_layers):
    def layernorm(x, gb):
        g, b = gb
        mu = jnp.mean(x, -1, keepdims=True)
        var = jnp.mean((x - mu) ** 2, -1, keepdims=True)
        return (x - mu) * lax.rsqrt(var + _LN_EPS) * g + b

    def embed(tok):
        x = params["emb_table"][tok] + params["pos_enc"][: tok.shape[1]][None]
        return layernorm(x, params["emb_ln"])

    def mha(q, k, v, p, masked):
        B, Sq, H = q.shape
        Sk = k.shape[1]
        dph = H // n_heads
        qh = q.reshape(B, n_heads, Sq, dph)
        kh = k.reshape(B, n_heads, Sk, dph)
        vh = v.reshape(B, n_heads, Sk, dph)
        wq, bq = p["wQ"]
        wk, bk = p["wK"]
        wv, bv = p["wV"]
        wf, bf = p["ffn"]
        qp = jnp.einsum("bhsd,ed->bhse", qh, wq) + bq
        kp = jnp.einsum("bhsd,ed->bhse", kh, wk) + bk
        vp = jnp.einsum("bhsd,ed->bhse", vh, wv) + bv
        score = jnp.einsum("bhqd,bhkd->bhqk", qp, kp) / math.sqrt(dph)
        if masked:
            tril = jnp.tril(jnp.ones((Sq, Sk)))
            score = jnp.where(tril == 0, -jnp.inf, score)
        attn = jax.nn.softmax(score, axis=-1)
        out = jnp.einsum("bhqk,bhkd->bhqd", attn, vp).reshape(B, Sq, H)
        return out @ wf.T + bf

    def ffn(x, p):
        w1, b1 = p["lin1"]
        w2, b2 = p["lin2"]
        h = jax.nn.gelu(x @ w1.T + b1, approximate=True)
        return h @ w2.T + b2

    x = embed(src_tok)
    for _ in range(num_layers):
        n1 = layernorm(x, params["enc_norm1"])
        x = x + mha(n1, n1, n1, params["enc_attn"], False)
        x = x + ffn(layernorm(x, params["enc_norm2"]), params["enc_ffn"])
    enc_out = x

    q = embed(tgt_tok)
    for _ in range(num_layers):
        n1 = layernorm(q, params["dec_norm1"])
        q = q + mha(n1, n1, n1, params["dec_self"], True)
        q = q + mha(layernorm(q, params["dec_norm2"]), enc_out, enc_out,
                    params["dec_cross"], False)
        q = q + ffn(layernorm(q, params["dec_norm3"]), params["dec_ffn"])
    wg, bg = params["gen"]
    return jnp.tanh(q @ wg.T + bg)


# ----------------------------------------------------------------------------
# Deterministic parameter init.
# TODO(synk): the module's init_weights() zeros every 1-D parameter (incl. LayerNorm gains),
# which makes the forward output identically zero; random non-degenerate values are used
# here so the kernels are numerically exercised.
# ----------------------------------------------------------------------------
def init_params(key, *, h_dim, n_heads, vocab_size, seq_len, dim_ff):
    dph = h_dim // n_heads

    def lin(kk, in_f, out_f):
        k1, k2 = jax.random.split(kk)
        bound = 1.0 / math.sqrt(in_f)
        return (jax.random.uniform(k1, (out_f, in_f), jnp.float32, -bound, bound),
                jax.random.uniform(k2, (out_f,), jnp.float32, -bound, bound))

    def ln(kk):
        k1, k2 = jax.random.split(kk)
        return (1.0 + 0.05 * jax.random.normal(k1, (h_dim,), jnp.float32),
                0.05 * jax.random.normal(k2, (h_dim,), jnp.float32))

    def mha(kk):
        k1, k2, k3, k4 = jax.random.split(kk, 4)
        return dict(wQ=lin(k1, dph, dph), wK=lin(k2, dph, dph),
                    wV=lin(k3, dph, dph), ffn=lin(k4, h_dim, h_dim))

    def ffn(kk):
        k1, k2 = jax.random.split(kk, 2)
        return dict(lin1=lin(k1, h_dim, dim_ff), lin2=lin(k2, dim_ff, h_dim))

    ks = list(jax.random.split(key, 13))
    return dict(
        emb_table=0.5 * jax.random.normal(ks[0], (vocab_size, h_dim), jnp.float32),
        emb_ln=ln(ks[1]),
        enc_attn=mha(ks[2]), enc_norm1=ln(ks[3]), enc_norm2=ln(ks[4]), enc_ffn=ffn(ks[5]),
        dec_self=mha(ks[6]), dec_cross=mha(ks[7]),
        dec_norm1=ln(ks[8]), dec_norm2=ln(ks[9]), dec_norm3=ln(ks[10]),
        dec_ffn=ffn(ks[11]),
        gen=lin(ks[12], h_dim, vocab_size),
        pos_enc=positional_encoding(seq_len, h_dim),
    )


if __name__ == "__main__":
    B, S, H, V = 2, 8, 32, 64
    n_heads, num_layers, dim_ff = 4, 2, 64
    # TODO(synk): padding_idx only affects nn.Embedding gradients, not the forward pass.

    root = jax.random.PRNGKey(0)
    k_par, k_src, k_tgt = jax.random.split(root, 3)
    params = init_params(k_par, h_dim=H, n_heads=n_heads, vocab_size=V,
                         seq_len=S, dim_ff=dim_ff)
    src_tok = jax.random.randint(k_src, (B, S), 0, V, dtype=jnp.int32)
    tgt_tok = jax.random.randint(k_tgt, (B, S), 0, V, dtype=jnp.int32)

    ref = transformer_ref(src_tok, tgt_tok, params, n_heads=n_heads, num_layers=num_layers)

    # --- correctness path: f32 activations + matmuls, exact softmax division ---
    fused32 = build_fused_params(params, n_heads=n_heads, mm_dtype=jnp.float32)
    out32 = transformer_forward(src_tok, tgt_tok, fused32, n_heads=n_heads,
                                num_layers=num_layers, mm_dtype=jnp.float32,
                                act_dtype=jnp.float32, approx_recip=False)
    out32 = jax.block_until_ready(out32)
    assert out32.shape == (B, S, V)
    err32 = float(jnp.max(jnp.abs(out32 - ref)))
    assert err32 < 5e-4, f"f32 mismatch vs reference: max abs err {err32}"

    # --- performance path: bf16 matmul operands AND bf16 inter-kernel activations ---
    fused16 = build_fused_params(params, n_heads=n_heads, mm_dtype=jnp.bfloat16)
    out16 = transformer_forward(src_tok, tgt_tok, fused16, n_heads=n_heads,
                                num_layers=num_layers, mm_dtype=jnp.bfloat16,
                                act_dtype=jnp.bfloat16, approx_recip=True)
    out16 = jax.block_until_ready(out16)
    assert out16.shape == (B, S, V)
    assert bool(jnp.isfinite(out16).all())
    # loose smoke-check only: exactness is verified by the f32 path above.
    err16 = float(jnp.max(jnp.abs(out16.astype(jnp.float32) - ref)))
    assert err16 < 0.5, f"bf16 smoke-check mismatch vs reference: max abs err {err16}"

    print("KERNEL_OK")
</pallas_src>

<mosaic_0001>
module attributes {stable_mosaic.version = 11 : i64} {
  func.func @_probe(%arg0: i32, %arg1: memref<8x128xf32, #tpu.memory_space<vmem>>, %arg2: memref<8x128xf32, #tpu.memory_space<vmem>>) attributes {dimension_semantics = [#tpu.dimension_semantics<arbitrary>], iteration_bounds = array<i64: 1>, scalar_prefetch = 0 : i64, scratch_operands = 0 : i64, tpu.core_type = #tpu.core_type<tc>, window_params = [{pipeline_mode = #tpu.pipeline_mode<synchronous>, transform_indices = @transform_0, window_bounds = array<i64: 8, 128>}, {pipeline_mode = #tpu.pipeline_mode<synchronous>, transform_indices = @transform_1, window_bounds = array<i64: 8, 128>}]} {
    %c0 = arith.constant 0 : index
    %c0_0 = arith.constant 0 : index
    %0 = vector.load %arg1[%c0, %c0_0] : memref<8x128xf32, #tpu.memory_space<vmem>>, vector<8x128xf32>
    %cst = arith.constant 1.000000e+00 : f32
    %1 = vector.broadcast %cst : f32 to vector<8x128xf32>
    %2 = arith.addf %0, %1 : vector<8x128xf32>
    %c0_1 = arith.constant 0 : index
    %c0_2 = arith.constant 0 : index
    %3 = vector.load %arg2[%c0_1, %c0_2] : memref<8x128xf32, #tpu.memory_space<vmem>>, vector<8x128xf32>
    tpu.vector_store %arg2[%c0_1, %c0_2], %2 {strides = array<i32>} : memref<8x128xf32, #tpu.memory_space<vmem>>, vector<8x128xf32>,
    return
  }
  func.func @transform_0(%arg0: i32) -> (i32, i32) {
    %c0_i32 = arith.constant 0 : i32
    %c0_i32_0 = arith.constant 0 : i32
    %c0_i32_1 = arith.constant 0 : i32
    return %c0_i32, %c0_i32_0 : i32, i32
  }
  func.func @transform_1(%arg0: i32) -> (i32, i32) {
    %c0_i32 = arith.constant 0 : i32
    %c0_i32_0 = arith.constant 0 : i32
    %c0_i32_1 = arith.constant 0 : i32
    return %c0_i32, %c0_i32_0 : i32, i32
  }
}

module attributes {stable_mosaic.version = 11 : i64} {
  func.func @_embed_ln_kernel(%arg0: i32, %arg1: memref<1x8x32xf32, #tpu.memory_space<vmem>>, %arg2: memref<8x32xf32, #tpu.memory_space<vmem>>, %arg3: memref<1x32xf32, #tpu.memory_space<vmem>>, %arg4: memref<1x32xf32, #tpu.memory_space<vmem>>, %arg5: memref<1x8x32xf32, #tpu.memory_space<vmem>>) attributes {dimension_semantics = [#tpu.dimension_semantics<parallel>], iteration_bounds = array<i64: 2>, scalar_prefetch = 0 : i64, scratch_operands = 0 : i64, tpu.core_type = #tpu.core_type<tc>, window_params = [{transform_indices = @transform_0, window_bounds = array<i64: 1, 8, 32>}, {pipeline_mode = #tpu.pipeline_mode<synchronous>, transform_indices = @transform_1, window_bounds = array<i64: 8, 32>}, {pipeline_mode = #tpu.pipeline_mode<synchronous>, transform_indices = @transform_2, window_bounds = array<i64: 1, 32>}, {pipeline_mode = #tpu.pipeline_mode<synchronous>, transform_indices = @transform_3, window_bounds = array<i64: 1, 32>}, {transform_indices = @transform_4, window_bounds = array<i64: 1, 8, 32>}]} {
    %c0 = arith.constant 0 : index
    %c0_0 = arith.constant 0 : index
    %c0_1 = arith.constant 0 : index
    %0 = vector.load %arg1[%c0, %c0_0, %c0_1] : memref<1x8x32xf32, #tpu.memory_space<vmem>>, vector<1x8x32xf32>
    %1 = vector.shape_cast %0 : vector<1x8x32xf32> to vector<8x32xf32>
    %c0_2 = arith.constant 0 : index
    %c0_3 = arith.constant 0 : index
    %2 = vector.load %arg2[%c0_2, %c0_3] : memref<8x32xf32, #tpu.memory_space<vmem>>, vector<8x32xf32>
    %3 = arith.addf %1, %2 : vector<8x32xf32>
    %c0_4 = arith.constant 0 : index
    %c0_5 = arith.constant 0 : index
    %4 = vector.load %arg3[%c0_4, %c0_5] : memref<1x32xf32, #tpu.memory_space<vmem>>, vector<1x32xf32>
    %c0_6 = arith.constant 0 : index
    %c0_7 = arith.constant 0 : index
    %5 = vector.load %arg4[%c0_6, %c0_7] : memref<1x32xf32, #tpu.memory_space<vmem>>, vector<1x32xf32>
    %cst = arith.constant dense<0.000000e+00> : vector<8xf32>
    %6 = vector.multi_reduction <add>, %3, %cst [1] : vector<8x32xf32> to vector<8xf32>
    %7 = vector.shape_cast %6 : vector<8xf32> to vector<8x1xf32>
    %cst_8 = arith.constant 3.200000e+01 : f32
    %8 = vector.broadcast %cst_8 : f32 to vector<8x1xf32>
    %9 = arith.divf %7, %8 : vector<8x1xf32>
    %10 = vector.broadcast %9 : vector<8x1xf32> to vector<8x32xf32>
    %11 = arith.subf %3, %10 : vector<8x32xf32>
    %12 = arith.mulf %11, %11 : vector<8x32xf32>
    %cst_9 = arith.constant dense<0.000000e+00> : vector<8xf32>
    %13 = vector.multi_reduction <add>, %12, %cst_9 [1] : vector<8x32xf32> to vector<8xf32>
    %14 = vector.shape_cast %13 : vector<8xf32> to vector<8x1xf32>
    %cst_10 = arith.constant 3.200000e+01 : f32
    %15 = vector.broadcast %cst_10 : f32 to vector<8x1xf32>
    %16 = arith.divf %14, %15 : vector<8x1xf32>
    %17 = vector.broadcast %9 : vector<8x1xf32> to vector<8x32xf32>
    %18 = arith.subf %3, %17 : vector<8x32xf32>
    %cst_11 = arith.constant 9.99999996E-13 : f32
    %19 = vector.broadcast %cst_11 : f32 to vector<8x1xf32>
    %20 = arith.addf %16, %19 : vector<8x1xf32>
    %21 = math.rsqrt %20 : vector<8x1xf32>
    %22 = vector.broadcast %21 : vector<8x1xf32> to vector<8x32xf32>
    %23 = arith.mulf %18, %22 : vector<8x32xf32>
    %24 = vector.broadcast %4 : vector<1x32xf32> to vector<8x32xf32>
    %25 = arith.mulf %23, %24 : vector<8x32xf32>
    %26 = vector.broadcast %5 : vector<1x32xf32> to vector<8x32xf32>
    %27 = arith.addf %25, %26 : vector<8x32xf32>
    %c0_12 = arith.constant 0 : index
    %c0_13 = arith.constant 0 : index
    %c0_14 = arith.constant 0 : index
    %28 = vector.load %arg5[%c0_12, %c0_13, %c0_14] : memref<1x8x32xf32, #tpu.memory_space<vmem>>, vector<1x8x32xf32>
    %29 = vector.shape_cast %28 : vector<1x8x32xf32> to vector<8x32xf32>
    %30 = vector.shape_cast %27 : vector<8x32xf32> to vector<1x8x32xf32>
    tpu.vector_store %arg5[%c0_12, %c0_13, %c0_14], %30 {strides = array<i32>} : memref<1x8x32xf32, #tpu.memory_space<vmem>>, vector<1x8x32xf32>,
    return
  }
  func.func @transform_0(%arg0: i32) -> (i32, i32, i32) {
    %c0_i32 = arith.constant 0 : i32
    %c0_i32_0 = arith.constant 0 : i32
    %c0_i32_1 = arith.constant 0 : i32
    return %arg0, %c0_i32, %c0_i32_0 : i32, i32, i32
  }
  func.func @transform_1(%arg0: i32) -> (i32, i32) {
    %c0_i32 = arith.constant 0 : i32
    %c0_i32_0 = arith.constant 0 : i32
    %c0_i32_1 = arith.constant 0 : i32
    return %c0_i32, %c0_i32_0 : i32, i32
  }
  func.func @transform_2(%arg0: i32) -> (i32, i32) {
    %c0_i32 = arith.constant 0 : i32
    %c0_i32_0 = arith.constant 0 : i32
    %c0_i32_1 = arith.constant 0 : i32
    return %c0_i32, %c0_i32_0 : i32, i32
  }
  func.func @transform_3(%arg0: i32) -> (i32, i32) {
    %c0_i32 = arith.constant 0 : i32
    %c0_i32_0 = arith.constant 0 : i32
    %c0_i32_1 = arith.constant 0 : i32
    return %c0_i32, %c0_i32_0 : i32, i32
  }
  func.func @transform_4(%arg0: i32) -> (i32, i32, i32) {
    %c0_i32 = arith.constant 0 : i32
    %c0_i32_0 = arith.constant 0 : i32
    %c0_i32_1 = arith.constant 0 : i32
    return %arg0, %c0_i32, %c0_i32_0 : i32, i32, i32
  }
}

</mosaic_0001>

<bundles_post_ra>
// kernel: tpu_custom_call.1
= control target key start
LH: loop header
LB: loop body
LE: loop exit
PB: predicated region body
PF: predicated region fallthrough
CT: control target
= control target key end

     0   :  { %6 = vsyncpa [#allocation3], 0  ;;  %s103_s0 = inlined_call_operand.hbm [shape: f32[8,128], index: 0, kind: input, shape index: {}]   ;;  %s104_s1 = inlined_call_operand.hbm [shape: f32[8,128], index: 1, kind: output, shape index: {}]  }
   0x1   :  { %7 = vsyncpa [#allocation4], 0  ;;  %s85_s6 = smov [#allocation2]  }
   0x2   :  { %s14_s7 = sshll.u32 %s85_s6, 4  ;;  %s15_s7 = int_to_ptr.vmem [resolvable:$true] %s14_s7 }
   0x3   :  { %s49_s8 = scalar_lea.vmem %s15_s7, 128  ;;  %p54_p1 = scmp.lt.s32.totalorder %s15_s7, %s15_s7 }
   0x4   :  { %p50_p0 = scmp.ne.s32.totalorder %s15_s7, %s49_s8  ;;  %p55_p2 = scmp.lt.s32.totalorder %s49_s8, %s49_s8 }
   0x6   :  { %p56_p3 = por %p55_p2, %p54_p1 }
   0x8   :  { %p57_p4 = pnand %p56_p3, %p50_p0 }
   0xa   :  { %60 = shalt.err (!%p57_p4)
}
   0xb   :  { %17 = dma.hbm_to_vmem [thread:$0]  %s103_s0, 128, %s15_s7, [#allocation3]  }
   0xc   :  { %81 = dma.done.wait [#allocation3], 128  }
   0xd   :  { %82 = vsyncadd [#allocation3], 4294967168  ;;  %s86_s11 = smov [#allocation5]   ;;  %v21_v0 = vld [vmem:[#allocation2] sm:$0xff] }
   0xe   :  { %s30_s12 = sshll.u32 %s86_s11, 4  ;;  %v22_v1 = vadd.f32 1.0, %v21_v0  ;;  %s31_s12 = int_to_ptr.vmem [resolvable:$true] %s30_s12 }
   0xf   :  { %s61_s13 = scalar_lea.vmem %s31_s12, 128  ;;  %p66_p6 = scmp.lt.s32.totalorder %s31_s12, %s31_s12 }
  0x10   :  { %23 = vst [vmem:[#allocation5] sm:$0xff] %v22_v1  ;;  %p62_p5 = scmp.ne.s32.totalorder %s31_s12, %s61_s13  ;;  %p67_p7 = scmp.lt.s32.totalorder %s61_s13, %s61_s13 }
  0x12   :  { %p68_p8 = por %p67_p7, %p66_p6 }
  0x14   :  { %p69_p9 = pnand %p68_p8, %p62_p5 }
  0x16   :  { %72 = shalt.err (!%p69_p9)
}
  0x17   :  { %33 = dma.vmem_to_hbm [thread:$0]  %s31_s12, 128, %s104_s1, [#allocation4]  }
  0x18   :  { %83 = dma.done.wait [#allocation4], 128  }
  0x19   :  { %84 = vsyncadd [#allocation4], 4294967168 }
  0x1a   :  { %37 = vsyncpa [#allocation3], 1 }
  0x1b   :  { %38 = vsyncpa [#allocation4], 1 }

// kernel: tpu_custom_call.1
= control target key start
LH: loop header
LB: loop body
LE: loop exit
PB: predicated region body
PF: predicated region fallthrough
CT: control target
= control target key end

     0   :  { %9 = vsyncpa [#allocation3], 0  ;;  %s757_s0 = inlined_call_operand.hbm [shape: f32[2,8,32], index: 0, kind: input, shape index: {}]   ;;  %s758_s1 = inlined_call_operand.hbm [shape: f32[8,32], index: 1, kind: input, shape index: {}]   ;;  %s759_s2 = inlined_call_operand.vmem [shape: f32[1,32], index: 2, kind: input, shape index: {}]   ;;  %s760_s3 = inlined_call_operand.vmem [shape: f32[1,32], index: 3, kind: input, shape index: {}]   ;;  %s761_s4 = inlined_call_operand.hbm [shape: f32[2,8,32], index: 4, kind: output, shape index: {}]  }
   0x1   :  { %11 = vsyncpa [#allocation3 + $0x1], 0 }
   0x2   :  { %12 = vsyncpa [#allocation6], 0 }
   0x3   :  { %13 = vsyncpa [#allocation4], 0 }
   0x4   :  { %15 = vsyncpa [#allocation4 + $0x1], 0  ;;  %s582_s15 = smov 0   ;;  %s584_s16 = smov 0  }
   0x5   :  { %s586_s17 = smov 0   ;;  %s588_s18 = smov 0  }
   0x6 LB: > { %s603_s19 = sadd.s32 4294967295, %s552_s18   ;;  %s355_s20 = sadd.s32 4294967294, %s552_s18   ;;  %s552_s18 = sphi %s588_s18, %s784_s18   ;;  %s548_s17 = sphi %s586_s17, %s783_s17   ;;  %s544_s16 = sphi %s584_s16, %s782_s16   ;;  %s540_s15 = sphi %s582_s15, %s781_s15  }
   0x7   : > { %p41_p0 = scmp.ne.s32.totalorder %s544_s16, %s540_s15  ;;  %p762_p1 = scmp.eq.s32.totalorder %s603_s19, 0 }
   0x8   : > { %p134_p3 = scmp.eq.s32.totalorder %s355_s20, 1  ;;  %p356_p5 = scmp.ge.s32.totalorder %s552_s18, 1 }
   0x9   : > { %p612_p4 = por %p762_p1, %p41_p0  ;;  %p141_p7 = scmp.lt.s32.totalorder %s552_s18, 3 }
   0xa   : > { %p617_p6 = por %p134_p3, %p41_p0  ;;  %s554_s24 = smov [#allocation5]  }
   0xb   : > { %s766_s21 = scalar_select %p612_p4, 1, 0 }
   0xc   : > { %s767_s22 = scalar_select %p617_p6, 1, 0 }
   0xd   : > { %p622_p8 = pnand %p356_p5, %p141_p7  ;;  %s154_s25 = sshll.u32 %s554_s24, 4  ;;  %s155_s25 = int_to_ptr.vmem [resolvable:$true] %s154_s25 }
   0xe   : > { %s630_s26 = sadd.s32 1, %s552_s18   ;;  %s28_s30 = sadd.s32 1, %s548_s17 }
   0xf   : > { %s768_s23 = scalar_select %p622_p8, 1, 0 }
  0x10   : > { %p379_p10 = pneg %p622_p8  ;;  %s25_s28 = ssub.s32 %s552_s18, %s630_s26 }
  0x11   : > { %p640_p12 = scmp.eq.s32.totalorder %s25_s28, 0  ;;  %p35_p13 = scmp.ne.s32.totalorder %s548_s17, %s544_s16 }
  0x12   : > { %p634_p11 = pnand %p379_p10, %p762_p1  ;;  %s441_s5 = scalar_lea.vmem %s155_s25, 128 }
  0x13   : > { %p442_p3 = scmp.ne.s32.totalorder %s155_s25, %s441_s5  ;;  %p449_p9 = scmp.lt.s32.totalorder %s155_s25, %s155_s25 }
  0x14   : > { %p432_p0 = pneg %p634_p11  ;;  %p450_p2 = scmp.lt.s32.totalorder %s441_s5, %s441_s5 }
  0x16   : > { %p444_p5 = pnand %p442_p3, %p432_p0  ;;  %p451_p10 = por %p450_p2, %p449_p9 }
  0x18   : > { %p445_p7 = pneg %p444_p5 }
  0x1a   : > { %p452_p1 = pnand %p451_p10, %p445_p7 }
  0x1c   : > { %455 = shalt.err (!%p452_p1)
}
  0x1d   : > { %382 = dma.hbm_to_vmem [thread:$0]  (!%p634_p11), %s758_s1, 128, %s155_s25, [#allocation6]  }
  0x1e   : > { %s657_s8 = scalar_select %p640_p12, %s548_s17, %s28_s30  }
  0x1f   : > { %p36_p1 = scmp.eq.s32.totalorder %s552_s18, 0  ;;  %p771_p2 = scmp.eq.s32.totalorder %s603_s19, 1 }
  0x20   : > { %p392_p0 = scmp.lt.s32.totalorder %s552_s18, 2  ;;  %s171_s10 = sand.u32 1, %s548_s17  }
  0x21   : > { %p665_p9 = por %p771_p2, %p35_p13  ;;  %p37_p3 = por %p36_p1, %p35_p13 }
  0x22   : > { %s359_s11 = sshll.u32 %s171_s10, 3  ;;  %s360_s12 = sshll.u32 %s552_s18, 7 }
  0x23   : > { %s772_s9 = scalar_select %p665_p9, 1, 0 }
  0x24   : > { %s678_s20 = scalar_lea.hbm %s757_s0, %s360_s12  ;;  %s175_s24 = scalar_lea.vmem [#allocation2], %s359_s11 }
  0x25   : > { %s182_s25 = sshll.u32 %s175_s24, 4  ;;  %p680_p11 = pnand %p392_p0, %p37_p3  ;;  %s183_s25 = int_to_ptr.vmem [resolvable:$true] %s182_s25 }
  0x26   : > { %s172_s28 = scalar_lea.sflag [#allocation3], %s171_s10  ;;  %s456_s29 = scalar_lea.hbm %s678_s20, 128 }
  0x27   : > { %p457_p12 = scmp.ne.s32.totalorder %s678_s20, %s456_s29  ;;  %p458_p13 = pneg %p680_p11 }
  0x28   : > { %s461_s6 = scalar_lea.hbm %s757_s0, 256  ;;  %p462_p10 = scmp.lt.s32.totalorder %s678_s20, %s757_s0 }
  0x29   : > { %p459_p5 = pnand %p458_p13, %p457_p12  ;;  %p463_p1 = scmp.lt.s32.totalorder %s461_s6, %s456_s29 }
  0x2b   : > { %p460_p7 = pneg %p459_p5  ;;  %p464_p2 = por %p463_p1, %p462_p10 }
  0x2d   : > { %p465_p0 = pnand %p464_p2, %p460_p7 }
  0x2f   : > { %468 = shalt.err (!%p465_p0)
}
  0x30   : > { %s469_s12 = scalar_lea.vmem %s183_s25, 128  ;;  %s555_s10 = smov [#allocation2]  }
  0x31   : > { %p470_p3 = scmp.ne.s32.totalorder %s183_s25, %s469_s12  ;;  %s474_s13 = sshll.u32 %s555_s10, 4  ;;  %s475_s13 = int_to_ptr.vmem [resolvable:$false] %s474_s13 }
  0x32   : > { %s476_s14 = scalar_lea.vmem %s475_s13, 256  ;;  %p477_p12 = scmp.lt.s32.totalorder %s183_s25, %s475_s13 }
  0x33   : > { %p472_p6 = pnand %p470_p3, %p458_p13  ;;  %p478_p5 = scmp.lt.s32.totalorder %s476_s14, %s469_s12 }
  0x35   : > { %p473_p9 = pneg %p472_p6  ;;  %p479_p4 = por %p478_p5, %p477_p12 }
  0x37   : > { %p480_p8 = pnand %p479_p4, %p473_p9 }
  0x39   : > { %483 = shalt.err (!%p480_p8)
}
  0x3a   : > { %386 = dma.hbm_to_vmem [thread:$0]  (!%p680_p11), %s678_s20, 128, %s183_s25, %s172_s28  }
  0x3b   : > { %p774_p7 = scmp.ne.s32.totalorder %s768_s23, 0 }
  0x3c   : > { %s701_s24 = sand.u32 (!%p774_p7), 1, %s544_s16   ;;  %p775_p6 = scmp.ne.s32.totalorder (!%p774_p7), %s766_s21, 0 }
  0x3d   : > { %191 = sbr.rel (%p774_p7) target bundleno = 394 (0x18a), region = 36  ;;  %s362_s29 = sshll.u32 (!%p774_p7), %s701_s24, 3 }
  0x3e   : > { %s194_s30 = scalar_lea.sflag (!%p774_p7), [#allocation3], %s701_s24  ;;  %s197_s5 = scalar_lea.vmem (!%p774_p7), [#allocation2], %s362_s29 }
  0x42   : > { %527 = dma.done.wait (%p775_p6), %s194_s30, 128  }
  0x43   : > { %529 = vsyncadd (%p775_p6), %s194_s30, 4294967168  ;;  %p776_p4 = scmp.eq.s32.totalorder %s603_s19, 0 }
  0x45   : > { %531 = dma.done.wait (%p776_p4), [#allocation6], 128   ;;  %p777_p8 = pmov %p776_p4 }
  0x46   : > { %v226_v0 = vld [vmem:[%s197_s5] sm:$0xff]  ;;  %v227_v1 = vld [vmem:[#allocation5] sm:$0xff]  ;;  %vm231_vm0 = vcmask 261120   ;;  %s368_s27 = sshll.u32 %s603_s19, 7  ;;  %s225_s28 = scalar_lea.vmem [#allocation7], %s362_s29 }
  0x47   : > { %533 = vsyncadd (%p777_p8), [#allocation6], 4294967168  ;;  %v228_v2 = vadd.f32 %v227_v1, %v226_v0  ;;  %v365_v13 = vld [vmem:[%s759_s2] ss:$0 sm:$0xff]  ;;  %s275_s6 = sshll.u32 %s225_s28, 4  ;;  %s273_s12 = scalar_lea.hbm %s761_s4, %s368_s27  ;;  %s276_s6 = int_to_ptr.vmem [resolvable:$true] %s275_s6 }
  0x48   : > { %v366_v15 = vld [vmem:[%s760_s3] ss:$0 sm:$0xff]  ;;  %s262_s10 = scalar_lea.sflag [#allocation4], %s701_s24  ;;  %s484_s13 = scalar_lea.vmem %s276_s6, 128 }
  0x49   : > { %v232_v3 = vsel %vm231_vm0, %v228_v2, 0.0  ;;  %p485_p9 = scmp.ne.s32.totalorder %s276_s6, %s484_s13  ;;  %p778_p11 = scmp.ne.s32.totalorder %s772_s9, 0 }
  0x4a   : > { %233 = vadd.xlane.f32.xlu0 %v232_v3  ;;  %s556_s14 = smov [#allocation7]  }
  0x4b   : > { %p486_p13 = pnand %p485_p9, %p778_p11  ;;  %s488_s30 = sshll.u32 %s556_s14, 4  ;;  %s489_s30 = int_to_ptr.vmem [resolvable:$false] %s488_s30 }
  0x4c   : > { %s490_s19 = scalar_lea.vmem %s489_s30, 256  ;;  %p491_p1 = scmp.lt.s32.totalorder %s276_s6, %s489_s30 }
  0x4d   : > { %p487_p10 = pneg %p486_p13  ;;  %p492_p2 = scmp.lt.s32.totalorder %s490_s19, %s484_s13 }
  0x4f   : > { %p493_p0 = por %p492_p2, %p491_p1 }
  0x51   : > { %p494_p3 = pnand %p493_p0, %p487_p10 }
  0xd3   : > { %v234_v4 = vpop.xlane.xlu0 %233 }
  0xd4   : > { %v236_v5 = vmul.f32 0.03125, %v234_v4 }
  0xd6   : > { %v237_v6 = vsub.f32 %v228_v2, %v236_v5 }
  0xd8   : > { %v238_v7 = vmul.f32 %v237_v6, %v237_v6 }
  0xda   : > { %v239_v8 = vsel %vm231_vm0, %v238_v7, 0.0 }
  0xdb   : > { %240 = vadd.xlane.f32.xlu0 %v239_v8 }
 0x164   : > { %v241_v9 = vpop.xlane.xlu0 %240 }
 0x165   : > { %v242_v10 = vmul.f32 0.03125, %v241_v9 }
 0x167   : > { %v243_v11 = vadd.f32 1e-12, %v242_v10 }
 0x169   : > { %428 = vrsqrt.f32 %v243_v11 }
 0x176   : > { %v429_v12 = vpop.eup %428 }
 0x177   : > { %v245_v14 = vmul.f32 %v429_v12, %v237_v6 }
 0x179   : > { %v252_v16 = vmul.f32 %v365_v13, %v245_v14 }
 0x17b   : > { %v259_v17 = vadd.f32 %v366_v15, %v252_v16 }
 0x17d   : > { %260 = vst.msk [vmem:[%s225_s28] sm:$0xff] %vm231_vm0, %v259_v17 }
 0x17e   : > { %497 = shalt.err (!%p494_p3)
}
 0x17f   : > { %s498_s29 = scalar_lea.hbm %s273_s12, 128  ;;  %s502_s21 = scalar_lea.hbm %s761_s4, 256 }
 0x180   : > { %p499_p12 = scmp.ne.s32.totalorder %s273_s12, %s498_s29  ;;  %p503_p6 = scmp.lt.s32.totalorder %s273_s12, %s761_s4 }
 0x181   : > { %p504_p4 = scmp.lt.s32.totalorder %s502_s21, %s498_s29 }
 0x182   : > { %p500_p5 = pnand %p499_p12, %p778_p11 }
 0x183   : > { %p505_p8 = por %p504_p4, %p503_p6 }
 0x184   : > { %p501_p7 = pneg %p500_p5 }
 0x186   : > { %p506_p9 = pnand %p505_p8, %p501_p7 }
 0x188   : > { %509 = shalt.err (!%p506_p9)
}
 0x189   : > { %377 = dma.vmem_to_hbm [thread:$0]  (%p778_p11), %s276_s6, 128, %s273_s12, %s262_s10  }
 0x18a PF: > { %s287_s25 = sand.u32 1, %s540_s15   ;;  %p779_p13 = scmp.ne.s32.totalorder %s767_s22, 0 }
 0x18b   : > { %p780_p10 = scmp.ge.s32.totalorder %s552_s18, 2  ;;  %s288_s27 = scalar_lea.sflag [#allocation4], %s287_s25 }
 0x18d   : > { %p388_p1 = pnand %p780_p10, %p779_p13 }
 0x18f   : > { %p389_p2 = pneg %p388_p1 }
 0x191   : > { %535 = dma.done.wait (%p389_p2), %s288_s27, 128  }
 0x192   : > { %537 = vsyncadd (%p389_p2), %s288_s27, 4294967168  ;;  %p18_p0 = scmp.ge.s32.totalorder %s630_s26, 4   ;;  %s781_s15 = smov %s544_s16 }
 0x193   : > { %s782_s16 = smov %s548_s17  ;;  %s783_s17 = smov %s657_s8 }
 0x194   : > { %s784_s18 = smov %s630_s26  ;;  %20 = sbr.rel (!%p18_p0) target bundleno = 6 (0x6), region = 85 }
 0x199   :  { %293 = vsyncpa [#allocation3], 1 }
 0x19a   :  { %295 = vsyncpa [#allocation3 + $0x1], 1 }
 0x19b   :  { %296 = vsyncpa [#allocation6], 1 }
 0x19c   :  { %297 = vsyncpa [#allocation4], 1 }
 0x19d   :  { %299 = vsyncpa [#allocation4 + $0x1], 1 }

</bundles_post_ra>
